<compile_context>
chip_gen: v5e
topology: v5e:2x2
jax: 0.10.0
libtpu: 0.0.40
codegen_flags: <defaults>
</compile_context>

<pallas_src>
import functools

import jax
import jax.numpy as jnp
from jax import lax
from jax.experimental import pallas as pl
from jax.experimental.pallas import tpu as pltpu


def _mixer_mse_kernel(x_ref, t_ref, o_ref, acc_ref, *, total_t, inv_t, need_mask):
    # x_ref, t_ref: (1, C, T_TILE) VMEM tiles of the batch-0 block.
    # o_ref: (1, 1) f32 output; acc_ref: (1, 1) f32 scratch accumulator.
    k = pl.program_id(0)

    @pl.when(k == 0)
    def _init():
        acc_ref[...] = jnp.zeros_like(acc_ref)

    xb = x_ref[0, 0:2, :].astype(jnp.float32)
    tb = t_ref[0, 0:2, :].astype(jnp.float32)
    d = xb - tb
    sq = d * d

    if need_mask:
        # Mask the padded tail of the last (partial) time tile.
        t_tile = x_ref.shape[2]
        col = lax.broadcasted_iota(jnp.int32, sq.shape, dimension=1)
        valid = (k * t_tile + col) < total_t
        sq = jnp.where(valid, sq, 0.0)

    acc_ref[...] += jnp.sum(sq)

    @pl.when(k == pl.num_programs(0) - 1)
    def _finalize():
        # mean(row0) + mean(row1) == sum(all) / T   (static 1/T multiply)
        o_ref[...] = acc_ref[...] * jnp.float32(inv_t)


def mixer_mse(x, target, *, t_tile=None):
    """Pallas implementation of MixerMSE.forward(x, target). Returns a scalar f32."""
    B, C, T = x.shape
    assert target.shape == x.shape
    assert C >= 2

    itemsize = jnp.dtype(x.dtype).itemsize

    if t_tile is None:
        # Keep double-buffered input footprint (2 inputs x 2 bufs x C x T_TILE x
        # itemsize) around 8 MiB so the same tiling works on v5e/v6e/v7x.
        budget_bytes = 8 * 1024 * 1024
        cap = max(128, (budget_bytes // (4 * C * itemsize)) // 128 * 128)
        t_tile = T if T <= cap else cap

    num_tiles = pl.cdiv(T, t_tile)
    need_mask = (T % t_tile) != 0

    kernel = functools.partial(
        _mixer_mse_kernel,
        total_t=T,
        inv_t=1.0 / T,
        need_mask=need_mask,
    )

    # 2T useful elements per input: sub + mul + add per element.
    flops = 3 * 2 * T
    bytes_accessed = 2 * C * T * itemsize + 4  # both inputs (batch 0 blocks) + scalar out

    out = pl.pallas_call(
        kernel,
        out_shape=jax.ShapeDtypeStruct((1, 1), jnp.float32),
        grid=(num_tiles,),
        in_specs=[
            pl.BlockSpec((1, C, t_tile), lambda k: (0, 0, k)),
            pl.BlockSpec((1, C, t_tile), lambda k: (0, 0, k)),
        ],
        out_specs=pl.BlockSpec((1, 1), lambda k: (0, 0)),
        scratch_shapes=[pltpu.VMEM((1, 1), jnp.float32)],
        compiler_params=pltpu.CompilerParams(
            dimension_semantics=("arbitrary",),  # T is a reduction axis
        ),
        cost_estimate=pl.CostEstimate(
            flops=flops, transcendentals=0, bytes_accessed=bytes_accessed
        ),
    )(x, target)
    return out[0, 0]


def _ref(x, target):
    return jnp.mean((x[0, 0, :] - target[0, 0, :]) ** 2) + jnp.mean(
        (x[0, 1, :] - target[0, 1, :]) ** 2
    )


if __name__ == "__main__":
    key = jax.random.PRNGKey(0)
    kx, kt, kx2, kt2 = jax.random.split(key, 4)

    # (batch=2, channels=4, time=16); only x[0, 0:2, :] participates, as in the module.
    x = jax.random.normal(kx, (2, 4, 16), dtype=jnp.float32)
    target = jax.random.normal(kt, (2, 4, 16), dtype=jnp.float32)

    loss = mixer_mse(x, target)
    jax.block_until_ready(loss)
    assert jnp.allclose(loss, _ref(x, target), rtol=1e-5, atol=1e-6), (
        loss,
        _ref(x, target),
    )

    # Exercise the tiled + masked (T % T_TILE != 0) accumulator path too.
    x2 = jax.random.normal(kx2, (2, 4, 300), dtype=jnp.float32)
    target2 = jax.random.normal(kt2, (2, 4, 300), dtype=jnp.float32)
    loss2 = mixer_mse(x2, target2, t_tile=128)
    jax.block_until_ready(loss2)
    assert jnp.allclose(loss2, _ref(x2, target2), rtol=1e-5, atol=1e-5), (
        loss2,
        _ref(x2, target2),
    )

    print("KERNEL_OK")
</pallas_src>

<mosaic_0001>
module attributes {stable_mosaic.version = 11 : i64} {
  func.func @_mixer_mse_kernel(%arg0: i32, %arg1: memref<1x4x16xf32, #tpu.memory_space<vmem>>, %arg2: memref<1x4x16xf32, #tpu.memory_space<vmem>>, %arg3: memref<1x1xf32, #tpu.memory_space<vmem>>, %arg4: memref<1x1xf32, #tpu.memory_space<vmem>>) attributes {dimension_semantics = [#tpu.dimension_semantics<arbitrary>], iteration_bounds = array<i64: 1>, scalar_prefetch = 0 : i64, scratch_operands = 1 : i64, tpu.core_type = #tpu.core_type<tc>, window_params = [{transform_indices = @transform_0, window_bounds = array<i64: 1, 4, 16>}, {transform_indices = @transform_1, window_bounds = array<i64: 1, 4, 16>}, {pipeline_mode = #tpu.pipeline_mode<synchronous>, transform_indices = @transform_2, window_bounds = array<i64: 1, 1>}]} {
    %c0_i32 = arith.constant 0 : i32
    %0 = arith.cmpi eq, %arg0, %c0_i32 : i32
    %1 = arith.extui %0 : i1 to i32
    %c0_i32_0 = arith.constant 0 : i32
    %2 = arith.cmpi ne, %1, %c0_i32_0 : i32
    scf.if %2 {
      %cst_12 = arith.constant 0.000000e+00 : f32
      %20 = vector.broadcast %cst_12 : f32 to vector<1x1xf32>
      %c0_13 = arith.constant 0 : index
      %c0_14 = arith.constant 0 : index
      %21 = vector.load %arg4[%c0_13, %c0_14] : memref<1x1xf32, #tpu.memory_space<vmem>>, vector<1x1xf32>
      tpu.vector_store %arg4[%c0_13, %c0_14], %20 {strides = array<i32>} : memref<1x1xf32, #tpu.memory_space<vmem>>, vector<1x1xf32>,
    } else {
    }
    %c0 = arith.constant 0 : index
    %c0_1 = arith.constant 0 : index
    %c0_2 = arith.constant 0 : index
    %3 = vector.load %arg1[%c0, %c0_1, %c0_2] : memref<1x4x16xf32, #tpu.memory_space<vmem>>, vector<1x2x16xf32>
    %4 = vector.shape_cast %3 : vector<1x2x16xf32> to vector<2x16xf32>
    %c0_3 = arith.constant 0 : index
    %c0_4 = arith.constant 0 : index
    %c0_5 = arith.constant 0 : index
    %5 = vector.load %arg2[%c0_3, %c0_4, %c0_5] : memref<1x4x16xf32, #tpu.memory_space<vmem>>, vector<1x2x16xf32>
    %6 = vector.shape_cast %5 : vector<1x2x16xf32> to vector<2x16xf32>
    %7 = arith.subf %4, %6 : vector<2x16xf32>
    %8 = arith.mulf %7, %7 : vector<2x16xf32>
    %c0_6 = arith.constant 0 : index
    %c0_7 = arith.constant 0 : index
    %9 = vector.load %arg4[%c0_6, %c0_7] : memref<1x1xf32, #tpu.memory_space<vmem>>, vector<1x1xf32>
    %10 = vector.shape_cast %8 : vector<2x16xf32> to vector<1x2x16xf32>
    %cst = arith.constant dense<0.000000e+00> : vector<1xf32>
    %11 = vector.multi_reduction <add>, %10, %cst [1, 2] : vector<1x2x16xf32> to vector<1xf32>
    %12 = vector.shape_cast %11 : vector<1xf32> to vector<1x1x1xf32>
    %13 = vector.extract %12[0, 0, 0] : f32 from vector<1x1x1xf32>
    %14 = vector.broadcast %13 : f32 to vector<1x1xf32>
    %15 = arith.addf %9, %14 : vector<1x1xf32>
    %c0_8 = arith.constant 0 : index
    %c0_9 = arith.constant 0 : index
    %16 = vector.load %arg4[%c0_8, %c0_9] : memref<1x1xf32, #tpu.memory_space<vmem>>, vector<1x1xf32>
    tpu.vector_store %arg4[%c0_8, %c0_9], %15 {strides = array<i32>} : memref<1x1xf32, #tpu.memory_space<vmem>>, vector<1x1xf32>,
    %c0_i32_10 = arith.constant 0 : i32
    %17 = arith.cmpi eq, %arg0, %c0_i32_10 : i32
    %18 = arith.extui %17 : i1 to i32
    %c0_i32_11 = arith.constant 0 : i32
    %19 = arith.cmpi ne, %18, %c0_i32_11 : i32
    scf.if %19 {
      %c0_12 = arith.constant 0 : index
      %c0_13 = arith.constant 0 : index
      %20 = vector.load %arg4[%c0_12, %c0_13] : memref<1x1xf32, #tpu.memory_space<vmem>>, vector<1x1xf32>
      %cst_14 = arith.constant 6.250000e-02 : f32
      %21 = vector.broadcast %cst_14 : f32 to vector<1x1xf32>
      %22 = arith.mulf %20, %21 : vector<1x1xf32>
      %c0_15 = arith.constant 0 : index
      %c0_16 = arith.constant 0 : index
      %23 = vector.load %arg3[%c0_15, %c0_16] : memref<1x1xf32, #tpu.memory_space<vmem>>, vector<1x1xf32>
      tpu.vector_store %arg3[%c0_15, %c0_16], %22 {strides = array<i32>} : memref<1x1xf32, #tpu.memory_space<vmem>>, vector<1x1xf32>,
    } else {
    }
    return
  }
  func.func @transform_0(%arg0: i32) -> (i32, i32, i32) {
    %c0_i32 = arith.constant 0 : i32
    %c0_i32_0 = arith.constant 0 : i32
    %c0_i32_1 = arith.constant 0 : i32
    return %c0_i32, %c0_i32_0, %arg0 : i32, i32, i32
  }
  func.func @transform_1(%arg0: i32) -> (i32, i32, i32) {
    %c0_i32 = arith.constant 0 : i32
    %c0_i32_0 = arith.constant 0 : i32
    %c0_i32_1 = arith.constant 0 : i32
    return %c0_i32, %c0_i32_0, %arg0 : i32, i32, i32
  }
  func.func @transform_2(%arg0: i32) -> (i32, i32) {
    %c0_i32 = arith.constant 0 : i32
    %c0_i32_0 = arith.constant 0 : i32
    %c0_i32_1 = arith.constant 0 : i32
    return %c0_i32, %c0_i32_0 : i32, i32
  }
}

</mosaic_0001>

<bundles_post_ra>
// kernel: tpu_custom_call.1
= control target key start
LH: loop header
LB: loop body
LE: loop exit
PB: predicated region body
PF: predicated region fallthrough
CT: control target
= control target key end

     0   :  { %7 = vsyncpa [#allocation4], 0  ;;  %s205_s0 = inlined_call_operand.hbm [shape: f32[2,4,16], index: 0, kind: input, shape index: {}]   ;;  %s206_s1 = inlined_call_operand.hbm [shape: f32[2,4,16], index: 1, kind: input, shape index: {}]   ;;  %s207_s2 = inlined_call_operand.hbm [shape: f32[1,1], index: 2, kind: output, shape index: {}]  }
   0x1   :  { %8 = vsyncpa [#allocation7], 0 }
   0x2   :  { %9 = vsyncpa [#allocation5], 0  ;;  %s15_s11 = sshll.u32 %s205_s0, 4  ;;  %s174_s12 = smov [#allocation3]   ;;  %s16_s11 = int_to_ptr.hbm [resolvable:$true] %s15_s11 }
   0x3   :  { %s17_s13 = sshll.u32 %s174_s12, 4  ;;  %s26_s16 = sshll.u32 %s206_s1, 4  ;;  %s18_s13 = int_to_ptr.vmem [resolvable:$true] %s17_s13  ;;  %s27_s16 = int_to_ptr.hbm [resolvable:$true] %s26_s16 }
   0x4   :  { %20 = dma.hbm_to_vmem [thread:$0]  %s16_s11, 64, %s18_s13, [#allocation4]  }
   0x5   :  { %s175_s17 = smov [#allocation6]  }
   0x6   :  { %s28_s18 = sshll.u32 %s175_s17, 4  ;;  %s29_s18 = int_to_ptr.vmem [resolvable:$true] %s28_s18 }
   0x7   :  { %31 = dma.hbm_to_vmem [thread:$0]  %s27_s16, 64, %s29_s18, [#allocation7]  }
   0x8   :  { %168 = dma.done.wait [#allocation4], 64  }
   0x9   :  { %169 = vsyncadd [#allocation4], 4294967232 }
   0xa   :  { %170 = dma.done.wait [#allocation7], 64  }
   0xb   :  { %171 = vsyncadd [#allocation7], 4294967232  ;;  %v46_v0 = vld [vmem:[#allocation3] sm:$0x3]  ;;  %v47_v1 = vld [vmem:[#allocation6] sm:$0x3] }
   0xc   :  { %v48_v2 = vsub.f32 %v46_v0, %v47_v1  ;;  %vm51_vm0 = vcmask 123904   ;;  %vm44_vm1 = vcmask 0   ;;  %v176_v5 = vmov 0.0   ;;  %s177_s1 = smov [#allocation8]   ;;  %s79_s22 = sshll.u32 %s207_s2, 4  ;;  %s80_s22 = int_to_ptr.hbm [resolvable:$true] %s79_s22 }
   0xd   :  { %45 = vst.msk [vmem:[#allocation2] sm:$0x1] %vm44_vm1, %v176_v5  ;;  %s77_s19 = sshll.u32 %s177_s1, 4  ;;  %s78_s19 = int_to_ptr.vmem [resolvable:$true] %s77_s19 }
   0xe   :  { %v49_v3 = vmul.f32 %v48_v2, %v48_v2 }
  0x10   :  { %v52_v4 = vsel %vm51_vm0, %v49_v3, 0.0 }
  0x11   :  { %53 = vadd.xlane.f32.xlu0 %v52_v4 }
  0x14   :  { %v50_v13 = vld [vmem:[#allocation2] sm:$0x1] }
  0x84   :  { %v54_v6 = vpop.xlane.xlu0 %53 }
  0x85   :  { %v55_v7 = vrot.slane %v54_v6, 4 }
  0x87   :  { %v56_v8 = vadd.f32 %v55_v7, %v54_v6 }
  0x89   :  { %v57_v9 = vrot.slane %v56_v8, 2 }
  0x8b   :  { %v58_v10 = vadd.f32 %v57_v9, %v56_v8 }
  0x8d   :  { %v59_v11 = vrot.slane %v58_v10, 1 }
  0x8f   :  { %v60_v12 = vadd.f32 %v59_v11, %v58_v10 }
  0x91   :  { %90 = vpush %v60_v12 }
  0xc2   :  { %s91_s0 = spop %90 }
  0xc3   :  { %v62_v14 = vstv %s91_s0 }
  0xc4   :  { %v63_v15 = vadd.f32 %v62_v14, %v50_v13 }
  0xc6   :  { %65 = vst.msk [vmem:[#allocation2] sm:$0x1] %vm44_vm1, %v63_v15 }
  0xcd   :  { %v69_v16 = vld [vmem:[#allocation2] sm:$0x1] }
  0xce   :  { %v70_v17 = vmul.f32 0.0625, %v69_v16 }
  0xd0   :  { %71 = vst.msk [vmem:[#allocation8] sm:$0x1] %vm44_vm1, %v70_v17 }
  0xd1   :  { %82 = dma.vmem_to_hbm [thread:$0]  %s78_s19, 16, %s80_s22, [#allocation5]  }
  0xd2   :  { %172 = dma.done.wait [#allocation5], 16  }
  0xd3   :  { %173 = vsyncadd [#allocation5], 4294967280 }
  0xd4   :  { %87 = vsyncpa [#allocation4], 1 }
  0xd5   :  { %88 = vsyncpa [#allocation7], 1 }
  0xd6   :  { %89 = vsyncpa [#allocation5], 1 }

</bundles_post_ra>
